<compile_context>
chip_gen: v7x
topology: tpu7x:2x2x1
jax: 0.10.0
libtpu: 0.0.40
codegen_flags: <defaults>
</compile_context>

<pallas_src>
import functools

import jax
import jax.numpy as jnp
from jax import lax
from jax.experimental import pallas as pl
from jax.experimental.pallas import tpu as pltpu

LANES = 128     # lane axis
SUB = 8         # sublane tile
MAX_BM = 1024   # rows per block (1024 x 128 f32 = 512 KiB per input per buffer)


def _l1_partial_kernel(r_ref, t_ref, o_ref, *, bm, total_rows, mask_rows):
    """Per-block partial sum of |r - t| as an (8, 128) f32 slab."""
    r = r_ref[...].astype(jnp.float32)
    t = t_ref[...].astype(jnp.float32)
    diff = jnp.abs(r - t)

    if mask_rows:
        # Only possible when rows % bm != 0: zero the rows of the last block
        # that lie past the real data (their VMEM contents are unspecified).
        row_ids = pl.program_id(0) * bm + lax.broadcasted_iota(
            jnp.int32, (bm, LANES), 0
        )
        diff = jnp.where(row_ids < total_rows, diff, jnp.float32(0.0))

    # Fold the bm rows down to a single vreg-shaped (8, 128) partial sum.
    partial = diff.reshape(bm // SUB, SUB, LANES).sum(axis=0)
    o_ref[...] = partial[None, :, :]


def spatial_metric(result, target):
    """1.0 - mean(|result - target|), computed with a Pallas TPU kernel."""
    assert result.shape == target.shape, "shape mismatch"
    n_elems = result.size

    # Flatten in the original dtype (cast to f32 happens inside the kernel).
    r_flat = result.reshape(-1)
    t_flat = target.reshape(-1)

    # Pad (with zeros -> contributes 0 to |a-b|) only if needed to form a
    # lane-dense (rows, 128) slab with rows a multiple of 8.
    min_chunk = SUB * LANES
    padded = ((n_elems + min_chunk - 1) // min_chunk) * min_chunk
    pad = padded - n_elems
    if pad:
        # TODO(synk): for sizes not aligned to 1024 this jnp.pad copies both
        # inputs; an in-kernel lane mask on a 1-D layout could avoid it.
        r_flat = jnp.pad(r_flat, (0, pad))
        t_flat = jnp.pad(t_flat, (0, pad))

    rows = padded // LANES               # always a multiple of SUB
    bm = min(MAX_BM, rows)               # multiple of SUB (1024 or == rows)
    num_blocks = (rows + bm - 1) // bm
    mask_rows = (rows % bm) != 0         # only the last block can be partial

    r2 = r_flat.reshape(rows, LANES)
    t2 = t_flat.reshape(rows, LANES)

    kernel = functools.partial(
        _l1_partial_kernel, bm=bm, total_rows=rows, mask_rows=mask_rows
    )

    partials = pl.pallas_call(
        kernel,
        out_shape=jax.ShapeDtypeStruct((num_blocks, SUB, LANES), jnp.float32),
        grid=(num_blocks,),
        in_specs=[
            pl.BlockSpec((bm, LANES), lambda i: (i, 0)),
            pl.BlockSpec((bm, LANES), lambda i: (i, 0)),
        ],
        out_specs=pl.BlockSpec((1, SUB, LANES), lambda i: (i, 0, 0)),
        compiler_params=pltpu.CompilerParams(
            dimension_semantics=("parallel",),
        ),
    )(r2, t2)

    # Final tiny reduction + 1 - mean in plain JAX.
    return jnp.float32(1.0) - jnp.sum(partials) / jnp.float32(n_elems)


if __name__ == "__main__":
    key = jax.random.PRNGKey(0)
    k1, k2 = jax.random.split(key)
    # Small NCHW shapes consistent with an image-metric module.
    result = jax.random.normal(k1, (2, 4, 16, 16), dtype=jnp.float32)
    target = jax.random.normal(k2, (2, 4, 16, 16), dtype=jnp.float32)

    out = jax.block_until_ready(spatial_metric(result, target))

    # Reference check (plain JAX).
    ref = 1.0 - jnp.mean(jnp.abs(result - target))
    assert jnp.allclose(out, ref, atol=1e-5, rtol=1e-5), (out, ref)
    print("KERNEL_OK")
</pallas_src>

<mosaic_0001>
module attributes {stable_mosaic.version = 11 : i64} {
  func.func @_l1_partial_kernel(%arg0: i32, %arg1: memref<16x128xf32, #tpu.memory_space<vmem>>, %arg2: memref<16x128xf32, #tpu.memory_space<vmem>>, %arg3: memref<1x8x128xf32, #tpu.memory_space<vmem>>) attributes {dimension_semantics = [#tpu.dimension_semantics<parallel>], iteration_bounds = array<i64: 1>, scalar_prefetch = 0 : i64, scratch_operands = 0 : i64, tpu.core_type = #tpu.core_type<tc>, window_params = [{transform_indices = @transform_0, window_bounds = array<i64: 16, 128>}, {transform_indices = @transform_1, window_bounds = array<i64: 16, 128>}, {transform_indices = @transform_2, window_bounds = array<i64: 1, 8, 128>}]} {
    %c0 = arith.constant 0 : index
    %c0_0 = arith.constant 0 : index
    %0 = vector.load %arg1[%c0, %c0_0] : memref<16x128xf32, #tpu.memory_space<vmem>>, vector<16x128xf32>
    %c0_1 = arith.constant 0 : index
    %c0_2 = arith.constant 0 : index
    %1 = vector.load %arg2[%c0_1, %c0_2] : memref<16x128xf32, #tpu.memory_space<vmem>>, vector<16x128xf32>
    %2 = arith.subf %0, %1 : vector<16x128xf32>
    %3 = math.absf %2 : vector<16x128xf32>
    %4 = vector.shape_cast %3 : vector<16x128xf32> to vector<2x8x128xf32>
    %cst = arith.constant dense<0.000000e+00> : vector<8x128xf32>
    %5 = vector.multi_reduction <add>, %4, %cst [0] : vector<2x8x128xf32> to vector<8x128xf32>
    %6 = vector.shape_cast %5 : vector<8x128xf32> to vector<1x8x128xf32>
    %c0_3 = arith.constant 0 : index
    %c0_4 = arith.constant 0 : index
    %c0_5 = arith.constant 0 : index
    %7 = vector.load %arg3[%c0_3, %c0_4, %c0_5] : memref<1x8x128xf32, #tpu.memory_space<vmem>>, vector<1x8x128xf32>
    tpu.vector_store %arg3[%c0_3, %c0_4, %c0_5], %6 {strides = array<i32>} : memref<1x8x128xf32, #tpu.memory_space<vmem>>, vector<1x8x128xf32>,
    return
  }
  func.func @transform_0(%arg0: i32) -> (i32, i32) {
    %c0_i32 = arith.constant 0 : i32
    %c0_i32_0 = arith.constant 0 : i32
    return %arg0, %c0_i32 : i32, i32
  }
  func.func @transform_1(%arg0: i32) -> (i32, i32) {
    %c0_i32 = arith.constant 0 : i32
    %c0_i32_0 = arith.constant 0 : i32
    return %arg0, %c0_i32 : i32, i32
  }
  func.func @transform_2(%arg0: i32) -> (i32, i32, i32) {
    %c0_i32 = arith.constant 0 : i32
    %c0_i32_0 = arith.constant 0 : i32
    %c0_i32_1 = arith.constant 0 : i32
    return %arg0, %c0_i32, %c0_i32_0 : i32, i32, i32
  }
}

</mosaic_0001>

<bundles_post_ra>
// kernel: tpu_custom_call.1
= control target key start
LH: loop header
LB: loop body
LE: loop exit
PB: predicated region body
PF: predicated region fallthrough
CT: control target
= control target key end

     0   :  { %7 = vsyncpa [#allocation3], 0  ;;  %s199_s0 = inlined_call_operand.hbm [shape: f32[16,128], index: 0, kind: input, shape index: {}]   ;;  %s200_s1 = inlined_call_operand.hbm [shape: f32[16,128], index: 1, kind: input, shape index: {}]   ;;  %s201_s2 = inlined_call_operand.hbm [shape: f32[1,8,128], index: 2, kind: output, shape index: {}]  }
   0x1   :  { %8 = vsyncpa [#allocation6], 0 }
   0x2   :  { %9 = vsyncpa [#allocation4], 0  ;;  %s143_s9 = smov [#allocation2]   ;;  %s71_s13 = scalar_lea.hbm %s199_s0, 256 }
   0x3   :  { %s15_s10 = sshll.u32 %s143_s9, 4  ;;  %p72_p0 = scmp.ne.s32.totalorder %s199_s0, %s71_s13  ;;  %s16_s10 = int_to_ptr.vmem [resolvable:$true] %s15_s10 }
   0x4   :  { %p75_p1 = scmp.lt.u32.totalorder %s71_s13, %s199_s0 }
   0x6   :  { %p77_p2 = pnand %p75_p1, %p72_p0 }
   0x8   :  { %80 = shalt.err (!%p77_p2)
}
   0x9   :  { %s81_s18 = scalar_lea.vmem %s16_s10, 256  ;;  %p86_p4 = scmp.lt.s32.totalorder %s16_s10, %s16_s10 }
   0xa   :  { %p82_p3 = scmp.ne.s32.totalorder %s16_s10, %s81_s18  ;;  %p87_p5 = scmp.lt.s32.totalorder %s81_s18, %s81_s18 }
   0xc   :  { %p88_p6 = por %p87_p5, %p86_p4 }
   0xe   :  { %p89_p7 = pnand %p88_p6, %p82_p3 }
  0x10   :  { %92 = shalt.err (!%p89_p7)
}
  0x11   :  { %s144_s19 = smov 128   ;;  %s145_s20 = smov 8  }
  0x12   :  { %21 = dma.hbm_to_vmem [thread:$0]  %s199_s0, 256, %s16_s10, [#allocation3], %s144_s19, %s144_s19, %s145_s20  }
  0x13   :  { %s146_s23 = smov [#allocation5]   ;;  %s93_s27 = scalar_lea.hbm %s200_s1, 256 }
  0x14   :  { %s27_s24 = sshll.u32 %s146_s23, 4  ;;  %p94_p8 = scmp.ne.s32.totalorder %s200_s1, %s93_s27  ;;  %s28_s24 = int_to_ptr.vmem [resolvable:$true] %s27_s24 }
  0x15   :  { %p97_p9 = scmp.lt.u32.totalorder %s93_s27, %s200_s1 }
  0x17   :  { %p99_p10 = pnand %p97_p9, %p94_p8 }
  0x19   :  { %102 = shalt.err (!%p99_p10)
}
  0x1a   :  { %s103_s4 = scalar_lea.vmem %s28_s24, 256  ;;  %p108_p12 = scmp.lt.s32.totalorder %s28_s24, %s28_s24 }
  0x1b   :  { %p104_p11 = scmp.ne.s32.totalorder %s28_s24, %s103_s4  ;;  %p109_p13 = scmp.lt.s32.totalorder %s103_s4, %s103_s4 }
  0x1d   :  { %p110_p0 = por %p109_p13, %p108_p12 }
  0x1f   :  { %p111_p1 = pnand %p110_p0, %p104_p11 }
  0x21   :  { %114 = shalt.err (!%p111_p1)
}
  0x22   :  { %33 = dma.hbm_to_vmem [thread:$0]  %s200_s1, 256, %s28_s24, [#allocation6], %s144_s19, %s144_s19, %s145_s20  }
  0x23   :  { %137 = dma.done.wait [#allocation3], 256  }
  0x24   :  { %138 = vsyncadd [#allocation3], 4294967040 }
  0x25   :  { %139 = dma.done.wait [#allocation6], 256  }
  0x26   :  { %140 = vsyncadd [#allocation6], 4294967040  ;;  %v40_v0 = vld [vmem:[#allocation2] sm:$0xff]  ;;  %v41_v1 = vld [vmem:[#allocation2 + $0x8] sm:$0xff]  ;;  %s147_s6 = smov [#allocation7]  }
  0x27   :  { %v42_v2 = vld [vmem:[#allocation5] sm:$0xff]  ;;  %v43_v3 = vld [vmem:[#allocation5 + $0x8] sm:$0xff]  ;;  %s56_s7 = sshll.u32 %s147_s6, 4  ;;  %s57_s7 = int_to_ptr.vmem [resolvable:$true] %s56_s7 }
  0x28   :  { %v44_v4 = vsub.f32 %v40_v0, %v42_v2  ;;  %v45_v5 = vsub.f32 %v41_v1, %v43_v3  ;;  %s115_s8 = scalar_lea.vmem %s57_s7, 128  ;;  %p120_p3 = scmp.lt.s32.totalorder %s57_s7, %s57_s7 }
  0x29   :  { %p116_p2 = scmp.ne.s32.totalorder %s57_s7, %s115_s8  ;;  %p121_p4 = scmp.lt.s32.totalorder %s115_s8, %s115_s8 }
  0x2a   :  { %v46_v6 = vand.u32 2147483647, %v44_v4  ;;  %v47_v7 = vand.u32 2147483647, %v45_v5 }
  0x2b   :  { %p122_p5 = por %p121_p4, %p120_p3 }
  0x2c   :  { %v48_v8 = vadd.f32 %v47_v7, %v46_v6 }
  0x2d   :  { %p123_p6 = pnand %p122_p5, %p116_p2 }
  0x2e   :  { %49 = vst [vmem:[#allocation7] sm:$0xff] %v48_v8 }
  0x2f   :  { %126 = shalt.err (!%p123_p6)
}
  0x30   :  { %s127_s10 = scalar_lea.hbm %s201_s2, 128 }
  0x31   :  { %p128_p7 = scmp.ne.s32.totalorder %s201_s2, %s127_s10  ;;  %p131_p8 = scmp.lt.u32.totalorder %s127_s10, %s201_s2 }
  0x33   :  { %p133_p9 = pnand %p131_p8, %p128_p7 }
  0x35   :  { %136 = shalt.err (!%p133_p9)
}
  0x36   :  { %59 = dma.vmem_to_hbm [thread:$0]  %s57_s7, 128, %s201_s2, [#allocation4]  }
  0x37   :  { %141 = dma.done.wait [#allocation4], 128  }
  0x38   :  { %142 = vsyncadd [#allocation4], 4294967168 }
  0x39   :  { %63 = vsyncpa [#allocation3], 1 }
  0x3a   :  { %64 = vsyncpa [#allocation6], 1 }
  0x3b   :  { %65 = vsyncpa [#allocation4], 1 }

</bundles_post_ra>
